<compile_context>
chip_gen: v6e
topology: v6e:2x2x1
jax: 0.10.0
libtpu: 0.0.40
codegen_flags: <defaults>
</compile_context>

<pallas_src>
import math

import jax
import jax.numpy as jnp
from jax.experimental import pallas as pl
from jax.experimental.pallas import tpu as pltpu

_LANE = 128
_SUB_F32 = 8
_TARGET_BLOCK_BYTES = 2 << 20        # ~2 MiB per block
_VMEM_LIMIT_BYTES = 32 * 1024 * 1024  # <= physical VMEM on v5e/v6e/v7x


def _drop_path_kernel(s_ref, x_ref, o_ref):
    # s_ref: (TB, 1[, 1]) float32, holds mask[b] / keep_prob per sample.
    # x_ref / o_ref: (TB, tile_rows, 128) or (TB, tile_cols) tile in x's dtype.
    # Keep the multiply in the tile's dtype (matches PyTorch x.div(keep_prob)
    # semantics for low-precision inputs).
    o_ref[...] = x_ref[...] * s_ref[...].astype(x_ref.dtype)


def _packed_sublanes(itemsize):
    # Rows per fully-packed vreg granule: 8 (f32), 16 (bf16/f16), 32 (int8/fp8).
    return _SUB_F32 * max(1, 4 // itemsize)


def _round_up(x, m):
    return ((x + m - 1) // m) * m


def drop_path(x, drop_prob, key, training=True):
    """Stochastic depth, matching PyTorch DropPath.forward semantics.

    x: (B, ...) any trailing shape.  drop_prob: python float.
    key: jax PRNG key for the per-sample Bernoulli draw.  training: python bool.
    """
    if drop_prob == 0.0 or not training:
        return x

    keep_prob = 1.0 - drop_prob
    B = x.shape[0]
    total = math.prod(x.shape[1:])

    # Mirrors: random_tensor = floor(keep_prob + rand(B,1,...)); x/keep_prob * random_tensor
    u = jax.random.uniform(key, (B,), dtype=jnp.float32)
    mask = jnp.floor(keep_prob + u)                  # 0. or 1. per sample
    scale = (mask / keep_prob).astype(jnp.float32)   # fold the 1/keep_prob in

    itemsize = jnp.dtype(x.dtype).itemsize
    compiler_params = pltpu.CompilerParams(
        dimension_semantics=("parallel", "parallel"),
        vmem_limit_bytes=_VMEM_LIMIT_BYTES,
    )

    if total % _LANE == 0:
        # ---------- lane-dense path: (B, rows, 128), zero wrapper HBM passes ----------
        rows = total // _LANE
        sub = _packed_sublanes(itemsize)
        bytes_per_row = _LANE * itemsize
        target_rows = max(sub, (_TARGET_BLOCK_BYTES // bytes_per_row) // sub * sub)

        if rows >= target_rows:
            # Large per-sample slab: big row tiles, one sample per block.
            # Non-dividing row counts -> partial (masked) last block, no pad.
            tile_rows, tb = target_rows, 1
        else:
            # Small per-sample slab: whole sample in one row tile, batch-block
            # to keep DMA blocks large despite the small feature size.
            tile_rows = _round_up(rows, sub)
            per_sample_bytes = rows * bytes_per_row
            tb = max(1, min(B, _TARGET_BLOCK_BYTES // max(per_sample_bytes, 1)))
            if tb >= B and B > 1 and B * per_sample_bytes >= (512 << 10):
                tb = pl.cdiv(B, 2)   # keep >= 2 grid steps for v7x's 2 TensorCores

        grid = (pl.cdiv(B, tb), pl.cdiv(rows, tile_rows))
        x3 = x.reshape(B, rows, _LANE)          # free (contiguous) reshape
        scale3 = scale.reshape(B, 1, 1)

        out = pl.pallas_call(
            _drop_path_kernel,
            out_shape=jax.ShapeDtypeStruct((B, rows, _LANE), x.dtype),
            grid_spec=pltpu.PrefetchScalarGridSpec(
                num_scalar_prefetch=0,
                grid=grid,
                in_specs=[
                    pl.BlockSpec((tb, 1, 1), lambda b, r: (b, 0, 0)),
                    pl.BlockSpec((tb, tile_rows, _LANE), lambda b, r: (b, r, 0)),
                ],
                out_specs=pl.BlockSpec((tb, tile_rows, _LANE), lambda b, r: (b, r, 0)),
            ),
            compiler_params=compiler_params,
        )(scale3, x3)
        return out.reshape(x.shape)

    # ---------- ragged path: features not a multiple of 128 ----------
    # Handle the ragged tail inside the kernel via a partial (masked) last
    # column block — still no wrapper-side pad / slice / concat passes.
    tb = B if B <= _SUB_F32 else _SUB_F32
    cols_target = max(
        _LANE, (_TARGET_BLOCK_BYTES // max(tb * itemsize, 1)) // _LANE * _LANE
    )
    tile_cols = min(cols_target, _round_up(total, _LANE))
    grid = (pl.cdiv(B, tb), pl.cdiv(total, tile_cols))

    x2 = x.reshape(B, total)
    scale2 = scale.reshape(B, 1)

    out = pl.pallas_call(
        _drop_path_kernel,
        out_shape=jax.ShapeDtypeStruct((B, total), x.dtype),
        grid_spec=pltpu.PrefetchScalarGridSpec(
            num_scalar_prefetch=0,
            grid=grid,
            in_specs=[
                pl.BlockSpec((tb, 1), lambda b, c: (b, 0)),
                pl.BlockSpec((tb, tile_cols), lambda b, c: (b, c)),
            ],
            out_specs=pl.BlockSpec((tb, tile_cols), lambda b, c: (b, c)),
        ),
        compiler_params=compiler_params,
    )(scale2, x2)
    return out.reshape(x.shape)


if __name__ == "__main__":
    key = jax.random.PRNGKey(0)
    kx, kmask, kx2, kx3 = jax.random.split(key, 4)

    drop_prob = 0.5
    keep_prob = 1.0 - drop_prob

    # Reference mask (same draw as inside drop_path)
    B = 2
    u = jax.random.uniform(kmask, (B,), dtype=jnp.float32)
    mask = jnp.floor(keep_prob + u)

    # ---- test 1: f32, NCHW shape from the UNeXt module, lane-divisible case
    x = jax.random.normal(kx, (2, 4, 16, 16), dtype=jnp.float32)
    y = jax.block_until_ready(drop_path(x, drop_prob, kmask, training=True))
    y_ref = x / keep_prob * mask.reshape(2, 1, 1, 1)
    assert jnp.allclose(y, y_ref, atol=1e-6), "mismatch vs reference (f32)"

    # ---- test 2: bf16, ragged feature count (exercises the in-kernel masked tail)
    x2 = jax.random.normal(kx2, (2, 3, 7, 9), dtype=jnp.bfloat16)
    y2 = jax.block_until_ready(drop_path(x2, drop_prob, kmask, training=True))
    y2_ref = (x2.astype(jnp.float32) / keep_prob * mask.reshape(2, 1, 1, 1)).astype(jnp.bfloat16)
    assert jnp.allclose(y2.astype(jnp.float32), y2_ref.astype(jnp.float32),
                        rtol=1e-2, atol=1e-2), "mismatch vs reference (bf16)"

    # ---- test 3: f32, lane-divisible but rows not a multiple of 8 (partial row block)
    x3 = jax.random.normal(kx3, (2, 3, 40, 32), dtype=jnp.float32)  # 3840 feats -> 30 rows
    y3 = jax.block_until_ready(drop_path(x3, drop_prob, kmask, training=True))
    y3_ref = x3 / keep_prob * mask.reshape(2, 1, 1, 1)
    assert jnp.allclose(y3, y3_ref, atol=1e-6), "mismatch vs reference (partial block)"

    # ---- eval path: identity
    y_eval = jax.block_until_ready(drop_path(x, drop_prob, kmask, training=False))
    assert jnp.allclose(y_eval, x), "eval path must be identity"

    print("KERNEL_OK")
</pallas_src>

<mosaic_0001>
module attributes {stable_mosaic.version = 11 : i64} {
  func.func @_drop_path_kernel(%arg0: i32, %arg1: i32, %arg2: memref<2x1x1xf32, #tpu.memory_space<vmem>>, %arg3: memref<2x8x128xf32, #tpu.memory_space<vmem>>, %arg4: memref<2x8x128xf32, #tpu.memory_space<vmem>>) attributes {dimension_semantics = [#tpu.dimension_semantics<parallel>, #tpu.dimension_semantics<parallel>], iteration_bounds = array<i64: 1, 1>, scalar_prefetch = 0 : i64, scratch_operands = 0 : i64, tpu.core_type = #tpu.core_type<tc>, window_params = [{transform_indices = @transform_0, window_bounds = array<i64: 2, 1, 1>}, {transform_indices = @transform_1, window_bounds = array<i64: 2, 8, 128>}, {transform_indices = @transform_2, window_bounds = array<i64: 2, 8, 128>}]} {
    %c0 = arith.constant 0 : index
    %c0_0 = arith.constant 0 : index
    %c0_1 = arith.constant 0 : index
    %0 = vector.load %arg3[%c0, %c0_0, %c0_1] : memref<2x8x128xf32, #tpu.memory_space<vmem>>, vector<2x8x128xf32>
    %c0_2 = arith.constant 0 : index
    %c0_3 = arith.constant 0 : index
    %c0_4 = arith.constant 0 : index
    %1 = vector.load %arg2[%c0_2, %c0_3, %c0_4] : memref<2x1x1xf32, #tpu.memory_space<vmem>>, vector<2x1x1xf32>
    %2 = vector.broadcast %1 : vector<2x1x1xf32> to vector<2x8x128xf32>
    %3 = arith.mulf %0, %2 : vector<2x8x128xf32>
    %c0_5 = arith.constant 0 : index
    %c0_6 = arith.constant 0 : index
    %c0_7 = arith.constant 0 : index
    %4 = vector.load %arg4[%c0_5, %c0_6, %c0_7] : memref<2x8x128xf32, #tpu.memory_space<vmem>>, vector<2x8x128xf32>
    tpu.vector_store %arg4[%c0_5, %c0_6, %c0_7], %3 {strides = array<i32>} : memref<2x8x128xf32, #tpu.memory_space<vmem>>, vector<2x8x128xf32>,
    return
  }
  func.func @transform_0(%arg0: i32, %arg1: i32) -> (i32, i32, i32) {
    %c0_i32 = arith.constant 0 : i32
    %c0_i32_0 = arith.constant 0 : i32
    %c0_i32_1 = arith.constant 0 : i32
    return %arg0, %c0_i32, %c0_i32_0 : i32, i32, i32
  }
  func.func @transform_1(%arg0: i32, %arg1: i32) -> (i32, i32, i32) {
    %c0_i32 = arith.constant 0 : i32
    %c0_i32_0 = arith.constant 0 : i32
    return %arg0, %arg1, %c0_i32 : i32, i32, i32
  }
  func.func @transform_2(%arg0: i32, %arg1: i32) -> (i32, i32, i32) {
    %c0_i32 = arith.constant 0 : i32
    %c0_i32_0 = arith.constant 0 : i32
    return %arg0, %arg1, %c0_i32 : i32, i32, i32
  }
}

</mosaic_0001>

<bundles_post_ra>
// kernel: tpu_custom_call.1
= control target key start
LH: loop header
LB: loop body
LE: loop exit
PB: predicated region body
PF: predicated region fallthrough
CT: control target
= control target key end

     0   :  { %7 = vsyncpa [#allocation3], 0  ;;  %s159_s0 = inlined_call_operand.vmem [shape: f32[2,1,1], index: 0, kind: input, shape index: {}]   ;;  %s160_s1 = inlined_call_operand.hbm [shape: f32[2,8,128], index: 1, kind: input, shape index: {}]   ;;  %s161_s2 = inlined_call_operand.hbm [shape: f32[2,8,128], index: 2, kind: output, shape index: {}]  }
   0x1   :  { %8 = vsyncpa [#allocation4], 0  ;;  %s121_s9 = smov [#allocation2]  }
   0x2   :  { %s16_s10 = sshll.u32 %s121_s9, 4  ;;  %s17_s10 = int_to_ptr.vmem [resolvable:$true] %s16_s10 }
   0x3   :  { %s85_s11 = scalar_lea.vmem %s17_s10, 256  ;;  %p90_p1 = scmp.lt.s32.totalorder %s17_s10, %s17_s10 }
   0x4   :  { %p86_p0 = scmp.ne.s32.totalorder %s17_s10, %s85_s11  ;;  %p91_p2 = scmp.lt.s32.totalorder %s85_s11, %s85_s11 }
   0x6   :  { %p92_p3 = por %p91_p2, %p90_p1 }
   0x8   :  { %p93_p4 = pnand %p92_p3, %p86_p0 }
   0xa   :  { %96 = shalt.err (!%p93_p4)
}
   0xb   :  { %s122_s12 = smov 128   ;;  %s123_s13 = smov 8  }
   0xc   :  { %22 = dma.hbm_to_vmem [thread:$0]  %s160_s1, 256, %s17_s10, [#allocation3], %s122_s12, %s122_s12, %s123_s13  }
   0xd   :  { %117 = dma.done.wait [#allocation3], 256  }
   0xe   :  { %118 = vsyncadd [#allocation3], 4294967040  ;;  %v124_v0 = vmov 0   ;;  %v69_v1 = vld [vmem:[%s159_s0] ss:$0 sm:$0xff]  ;;  %v27_v6 = vld [vmem:[#allocation2 + $0x8] sm:$0xff] }
   0xf   :  { %76 = vset.pattern.permute.xlu0 %v124_v0  ;;  %v70_v2 = vld [vmem:[%s159_s0 + $0x1] ss:$0 sm:$0xff]  ;;  %s125_s20 = smov [#allocation5]  }
  0x10   :  { %41 = vperm.xlu0 %76, %v69_v1   ;;  %v26_v3 = vld [vmem:[#allocation2] sm:$0xff]  ;;  %s57_s1 = sshll.u32 %s125_s20, 4  ;;  %s58_s1 = int_to_ptr.vmem [resolvable:$true] %s57_s1 }
  0x11   :  { %s97_s21 = scalar_lea.vmem %s58_s1, 256  ;;  %p102_p6 = scmp.lt.s32.totalorder %s58_s1, %s58_s1 }
  0x12   :  { %p98_p5 = scmp.ne.s32.totalorder %s58_s1, %s97_s21  ;;  %p103_p7 = scmp.lt.s32.totalorder %s97_s21, %s97_s21 }
  0x14   :  { %45 = vperm.xlu0 %76, %v70_v2   ;;  %p104_p8 = por %p103_p7, %p102_p6 }
  0x16   :  { %p105_p9 = pnand %p104_p8, %p98_p5 }
  0x8b   :  { %v42_v4 = vpop.permute.xlu0 %41 }
  0x8c   :  { %v48_v5 = vmul.f32 %v42_v4, %v26_v3 }
  0x8e   :  { %50 = vst [vmem:[#allocation5] sm:$0xff] %v48_v5 }
  0x8f   :  { %v46_v7 = vpop.permute.xlu0 %45 }
  0x90   :  { %v49_v8 = vmul.f32 %v46_v7, %v27_v6 }
  0x92   :  { %51 = vst [vmem:[#allocation5 + $0x8] sm:$0xff] %v49_v8 }
  0x93   :  { %108 = shalt.err (!%p105_p9)
}
  0x94   :  { %63 = dma.vmem_to_hbm [thread:$0]  %s58_s1, 256, %s161_s2, [#allocation4], %s122_s12, %s122_s12, %s123_s13  }
  0x95   :  { %119 = dma.done.wait [#allocation4], 256  }
  0x96   :  { %120 = vsyncadd [#allocation4], 4294967040 }
  0x97   :  { %67 = vsyncpa [#allocation3], 1 }
  0x98   :  { %68 = vsyncpa [#allocation4], 1 }

</bundles_post_ra>
